<compile_context>
chip_gen: v7x
topology: tpu7x:2x2x1
jax: 0.10.0
libtpu: 0.0.40
codegen_flags: <defaults>
</compile_context>

<pallas_src>
import functools

import jax
import jax.numpy as jnp
from jax import lax
from jax.experimental import pallas as pl
from jax.experimental.pallas import tpu as pltpu

# Large finite negative: exp(mask - rowmax) underflows to exactly 0.0 in f32,
# but fully-masked rows would give 0/num instead of NaN (robustness).
_MASK_VALUE = -0.7 * float(jnp.finfo(jnp.float32).max)


def _attn_kernel(x_ref, w_ref, o_ref, *, num_heads, head_size, mask_value):
    # x_ref: (1, T, C)   w_ref: (3, C, H*hs)   o_ref: (1, T, H*hs)
    T = x_ref.shape[1]
    H, hs = num_heads, head_size
    in_dt = x_ref.dtype

    x = x_ref[0]            # (T, C)
    wq = w_ref[0]           # (C, H*hs) -- C**-0.5 already folded in
    wk = w_ref[1]
    wv = w_ref[2]

    # Q/K/V projections on the MXU, f32 accumulation, kept in the matmul dtype
    # (bf16 stays bf16 for the following MXU passes; f32 is a no-op cast).
    q = jnp.dot(x, wq, preferred_element_type=jnp.float32).astype(in_dt)
    k = jnp.dot(x, wk, preferred_element_type=jnp.float32).astype(in_dt)
    v = jnp.dot(x, wv, preferred_element_type=jnp.float32).astype(in_dt)

    # Split heads: (T, H*hs) -> (H, T, hs).
    qh = jnp.swapaxes(q.reshape(T, H, hs), 0, 1)
    kh = jnp.swapaxes(k.reshape(T, H, hs), 0, 1)
    vh = jnp.swapaxes(v.reshape(T, H, hs), 0, 1)

    # Per-head scores in f32: (H, T, T).  Scale is already in Wq.
    s = jnp.einsum('hqd,hkd->hqk', qh, kh, preferred_element_type=jnp.float32)

    # Causal (lower-triangular) mask.
    row = lax.broadcasted_iota(jnp.int32, (T, T), 0)
    col = lax.broadcasted_iota(jnp.int32, (T, T), 1)
    s = jnp.where((col <= row)[None, :, :], s, mask_value)

    # Numerically stable softmax in f32 with an EXACT divide (no approx reciprocal).
    s = s - jnp.max(s, axis=-1, keepdims=True)
    p = jnp.exp(s)
    l = jnp.sum(p, axis=-1, keepdims=True)                  # (H, T, 1), >= 1

    # TODO(synk): dropout on p (training mode) not implemented -- identity (eval).
    acc = jnp.einsum('hqk,hkd->hqd', p.astype(in_dt), vh,
                     preferred_element_type=jnp.float32)    # (H, T, hs) f32
    out = acc / l                                           # exact normalization

    # (H, T, hs) -> (T, H*hs): heads concatenated along the lane axis (dense store
    # when H*hs >= 128).
    out = jnp.swapaxes(out, 0, 1).reshape(T, H * hs)
    o_ref[0] = out.astype(o_ref.dtype)


def fused_heads_attention(x, wq, wk, wv, *, compute_dtype=None):
    """Causal self-attention for H heads fused into one Pallas kernel (eval mode).

    x:           (B, T, C)
    wq, wk, wv:  (H, head_size, C)   -- nn.Linear weight layout, per head
    returns:     (B, T, H*head_size) -- per-head outputs concatenated on the last dim
    """
    B, T, C = x.shape
    H, hs, C2 = wq.shape
    assert C2 == C and wk.shape == wq.shape and wv.shape == wq.shape
    N = H * hs
    orig_dtype = x.dtype
    scale = float(C) ** -0.5          # matches the reference: C = n_embd

    def to_cn(w):                     # (H, hs, C) -> (C, H*hs) = [W_0^T | ... | W_{H-1}^T]
        return jnp.transpose(w, (2, 0, 1)).reshape(C, N)

    # Scale folded into Wq once, outside the kernel; stacked as (3, C, N) so the
    # kernel indexes whole (C, N) slabs instead of slicing inside a vreg tile.
    w_stack = jnp.stack([to_cn(wq) * scale, to_cn(wk), to_cn(wv)], axis=0)

    if compute_dtype is not None:     # bf16 recommended on v6e/v7x; keep f32 on v5e
        x = x.astype(compute_dtype)
        w_stack = w_stack.astype(compute_dtype)

    kernel = functools.partial(_attn_kernel, num_heads=H, head_size=hs,
                               mask_value=_MASK_VALUE)

    flops = int(B * (2 * T * C * 3 * N + 4 * H * T * T * hs))
    transcendentals = int(B * H * T * T)
    bytes_accessed = int(x.size * x.dtype.itemsize
                         + w_stack.size * w_stack.dtype.itemsize
                         + B * T * N * orig_dtype.itemsize)

    # One grid step per batch element; "parallel" lets v7x shard the axis across its
    # two TensorCores.  At these sizes everything (x, w, scores) fits VMEM easily.
    return pl.pallas_call(
        kernel,
        out_shape=jax.ShapeDtypeStruct((B, T, N), orig_dtype),
        grid=(B,),
        in_specs=[
            pl.BlockSpec((1, T, C), lambda b: (b, 0, 0),
                         memory_space=pltpu.MemorySpace.VMEM),
            pl.BlockSpec((3, C, N), lambda b: (0, 0, 0),
                         memory_space=pltpu.MemorySpace.VMEM),
        ],
        out_specs=pl.BlockSpec((1, T, N), lambda b: (b, 0, 0),
                               memory_space=pltpu.MemorySpace.VMEM),
        compiler_params=pltpu.CompilerParams(dimension_semantics=("parallel",)),
        cost_estimate=pl.CostEstimate(flops=flops,
                                      transcendentals=transcendentals,
                                      bytes_accessed=bytes_accessed),
    )(x, w_stack)


def head_attention(x, wq, wk, wv, *, compute_dtype=None):
    """One `Head` (the PyTorch module). wq/wk/wv: (head_size, C). Returns (B, T, head_size)."""
    return fused_heads_attention(x, wq[None], wk[None], wv[None],
                                 compute_dtype=compute_dtype)


def _reference(x, wq, wk, wv):
    """Plain-JAX single-head reference mirroring the PyTorch forward (eval mode)."""
    B, T, C = x.shape
    q = x @ wq.T
    k = x @ wk.T
    v = x @ wv.T
    s = jnp.einsum('btd,bsd->bts', q, k) * (C ** -0.5)
    mask = jnp.tril(jnp.ones((T, T), dtype=bool))
    s = jnp.where(mask[None], s, -jnp.inf)
    p = jax.nn.softmax(s, axis=-1)
    return jnp.einsum('bts,bsd->btd', p, v)


if __name__ == "__main__":
    # Module config: block_size=8, n_embd=32, head_size=16; batch=2.
    B, T, C = 2, 8, 32
    head_size = 16

    key = jax.random.PRNGKey(0)
    kx, kq, kk, kv = jax.random.split(key, 4)
    x = jax.random.normal(kx, (B, T, C), dtype=jnp.float32)
    wq = jax.random.normal(kq, (head_size, C), dtype=jnp.float32) * (C ** -0.5)
    wk = jax.random.normal(kk, (head_size, C), dtype=jnp.float32) * (C ** -0.5)
    wv = jax.random.normal(kv, (head_size, C), dtype=jnp.float32) * (C ** -0.5)

    # 1) The `Head` module itself (single head, f32).
    #    Tolerance 1e-2 covers the TPU's default (bf16-pass) f32 matmul precision on
    #    real hardware; interpret mode / exact math is far inside it.
    out = jax.block_until_ready(head_attention(x, wq, wk, wv))
    ref = _reference(x, wq, wk, wv)
    assert out.shape == (B, T, head_size)
    assert jnp.allclose(out, ref, atol=1e-2, rtol=1e-2), "single-head mismatch"

    # 2) Fused multi-head variant (H*hs = 128 -> lane-dense projections and output).
    H = 8
    kq8, kk8, kv8 = jax.random.split(jax.random.PRNGKey(1), 3)
    wq8 = jax.random.normal(kq8, (H, head_size, C), dtype=jnp.float32) * (C ** -0.5)
    wk8 = jax.random.normal(kk8, (H, head_size, C), dtype=jnp.float32) * (C ** -0.5)
    wv8 = jax.random.normal(kv8, (H, head_size, C), dtype=jnp.float32) * (C ** -0.5)
    out8 = jax.block_until_ready(fused_heads_attention(x, wq8, wk8, wv8))
    ref8 = jnp.concatenate(
        [_reference(x, wq8[h], wk8[h], wv8[h]) for h in range(H)], axis=-1)
    assert out8.shape == (B, T, H * head_size)
    assert jnp.allclose(out8, ref8, atol=1e-2, rtol=1e-2), "fused-head mismatch"

    # 3) bf16 matmul inputs (recommended on v6e/v7x); softmax/accumulation stay f32.
    #    Loose tolerance: bf16 input rounding gives ~1e-2-scale deviations vs f32.
    out8_bf16 = jax.block_until_ready(
        fused_heads_attention(x, wq8, wk8, wv8, compute_dtype=jnp.bfloat16))
    assert jnp.allclose(out8_bf16, ref8, atol=1e-1, rtol=1e-1), "bf16 mismatch"

    print("KERNEL_OK")
</pallas_src>

<mosaic_0001>
module attributes {stable_mosaic.version = 11 : i64} {
  func.func @_attn_kernel(%arg0: i32, %arg1: memref<1x8x32xf32, #tpu.memory_space<vmem>>, %arg2: memref<3x32x16xf32, #tpu.memory_space<vmem>>, %arg3: memref<1x8x16xf32, #tpu.memory_space<vmem>>) attributes {dimension_semantics = [#tpu.dimension_semantics<parallel>], iteration_bounds = array<i64: 2>, scalar_prefetch = 0 : i64, scratch_operands = 0 : i64, tpu.core_type = #tpu.core_type<tc>, window_params = [{transform_indices = @transform_0, window_bounds = array<i64: 1, 8, 32>}, {pipeline_mode = #tpu.pipeline_mode<synchronous>, transform_indices = @transform_1, window_bounds = array<i64: 3, 32, 16>}, {transform_indices = @transform_2, window_bounds = array<i64: 1, 8, 16>}]} {
    %c0 = arith.constant 0 : index
    %c0_0 = arith.constant 0 : index
    %c0_1 = arith.constant 0 : index
    %0 = vector.load %arg1[%c0, %c0_0, %c0_1] : memref<1x8x32xf32, #tpu.memory_space<vmem>>, vector<1x8x32xf32>
    %1 = vector.shape_cast %0 : vector<1x8x32xf32> to vector<8x32xf32>
    %c0_2 = arith.constant 0 : index
    %c0_3 = arith.constant 0 : index
    %c0_4 = arith.constant 0 : index
    %2 = vector.load %arg2[%c0_2, %c0_3, %c0_4] : memref<3x32x16xf32, #tpu.memory_space<vmem>>, vector<1x32x16xf32>
    %3 = vector.shape_cast %2 : vector<1x32x16xf32> to vector<32x16xf32>
    %c1 = arith.constant 1 : index
    %c0_5 = arith.constant 0 : index
    %c0_6 = arith.constant 0 : index
    %4 = vector.load %arg2[%c1, %c0_5, %c0_6] : memref<3x32x16xf32, #tpu.memory_space<vmem>>, vector<1x32x16xf32>
    %5 = vector.shape_cast %4 : vector<1x32x16xf32> to vector<32x16xf32>
    %c2 = arith.constant 2 : index
    %c0_7 = arith.constant 0 : index
    %c0_8 = arith.constant 0 : index
    %6 = vector.load %arg2[%c2, %c0_7, %c0_8] : memref<3x32x16xf32, #tpu.memory_space<vmem>>, vector<1x32x16xf32>
    %7 = vector.shape_cast %6 : vector<1x32x16xf32> to vector<32x16xf32>
    %cst = arith.constant dense<0.000000e+00> : vector<8x16xf32>
    %8 = tpu.matmul %1, %3, %cst {dimension_numbers = #tpu.dot_dimension_numbers<[1], [0], [0], [1], [0, 0, 1, 1], [], []>} : vector<8x32xf32>, vector<32x16xf32>, vector<8x16xf32> -> vector<8x16xf32>
    %cst_9 = arith.constant dense<0.000000e+00> : vector<8x16xf32>
    %9 = tpu.matmul %1, %5, %cst_9 {dimension_numbers = #tpu.dot_dimension_numbers<[1], [0], [0], [1], [0, 0, 1, 1], [], []>} : vector<8x32xf32>, vector<32x16xf32>, vector<8x16xf32> -> vector<8x16xf32>
    %cst_10 = arith.constant dense<0.000000e+00> : vector<8x16xf32>
    %10 = tpu.matmul %1, %7, %cst_10 {dimension_numbers = #tpu.dot_dimension_numbers<[1], [0], [0], [1], [0, 0, 1, 1], [], []>} : vector<8x32xf32>, vector<32x16xf32>, vector<8x16xf32> -> vector<8x16xf32>
    %11 = vector.shape_cast %8 : vector<8x16xf32> to vector<8x1x16xf32>
    %12 = tpu.transpose %11, [1, 0, 2] : vector<8x1x16xf32> -> vector<1x8x16xf32>
    %13 = vector.shape_cast %9 : vector<8x16xf32> to vector<8x1x16xf32>
    %14 = tpu.transpose %13, [1, 0, 2] : vector<8x1x16xf32> -> vector<1x8x16xf32>
    %15 = vector.shape_cast %10 : vector<8x16xf32> to vector<8x1x16xf32>
    %16 = tpu.transpose %15, [1, 0, 2] : vector<8x1x16xf32> -> vector<1x8x16xf32>
    "tpu.trace_start"() <{level = 10 : i32, message = "hqd,hkd->hqk"}> : () -> ()
    %cst_11 = arith.constant dense<0.000000e+00> : vector<1x8x8xf32>
    %17 = tpu.matmul %12, %14, %cst_11 {dimension_numbers = #tpu.dot_dimension_numbers<[2], [2], [1], [1], [0, 0, 0, 1, 1, 1], [0], [0]>} : vector<1x8x16xf32>, vector<1x8x16xf32>, vector<1x8x8xf32> -> vector<1x8x8xf32>
    "tpu.trace_stop"() : () -> ()
    %18 = tpu.iota {dimensions = array<i32: 0>} : vector<8x8xi32>
    %19 = tpu.iota {dimensions = array<i32: 1>} : vector<8x8xi32>
    %20 = arith.cmpi sle, %19, %18 : vector<8x8xi32>
    %21 = vector.shape_cast %20 : vector<8x8xi1> to vector<1x8x8xi1>
    %cst_12 = arith.constant -2.38197633E+38 : f32
    %22 = vector.broadcast %cst_12 : f32 to vector<1x8x8xf32>
    %23 = arith.select %21, %17, %22 : vector<1x8x8xi1>, vector<1x8x8xf32>
    %cst_13 = arith.constant dense<0xFF800000> : vector<1x8xf32>
    %24 = vector.multi_reduction <maximumf>, %23, %cst_13 [2] : vector<1x8x8xf32> to vector<1x8xf32>
    %25 = vector.shape_cast %24 : vector<1x8xf32> to vector<1x8x1xf32>
    %26 = vector.broadcast %25 : vector<1x8x1xf32> to vector<1x8x8xf32>
    %27 = arith.subf %23, %26 : vector<1x8x8xf32>
    %28 = math.exp %27 : vector<1x8x8xf32>
    %cst_14 = arith.constant dense<0.000000e+00> : vector<1x8xf32>
    %29 = vector.multi_reduction <add>, %28, %cst_14 [2] : vector<1x8x8xf32> to vector<1x8xf32>
    %30 = vector.shape_cast %29 : vector<1x8xf32> to vector<1x8x1xf32>
    "tpu.trace_start"() <{level = 10 : i32, message = "hqk,hkd->hqd"}> : () -> ()
    %cst_15 = arith.constant dense<0.000000e+00> : vector<1x8x16xf32>
    %31 = tpu.matmul %28, %16, %cst_15 {dimension_numbers = #tpu.dot_dimension_numbers<[2], [1], [1], [2], [0, 0, 0, 1, 1, 2], [0], [0]>} : vector<1x8x8xf32>, vector<1x8x16xf32>, vector<1x8x16xf32> -> vector<1x8x16xf32>
    "tpu.trace_stop"() : () -> ()
    %32 = vector.broadcast %30 : vector<1x8x1xf32> to vector<1x8x16xf32>
    %33 = arith.divf %31, %32 : vector<1x8x16xf32>
    %34 = tpu.transpose %33, [1, 0, 2] : vector<1x8x16xf32> -> vector<8x1x16xf32>
    %35 = vector.shape_cast %34 : vector<8x1x16xf32> to vector<8x16xf32>
    %c0_16 = arith.constant 0 : index
    %c0_17 = arith.constant 0 : index
    %c0_18 = arith.constant 0 : index
    %36 = vector.load %arg3[%c0_16, %c0_17, %c0_18] : memref<1x8x16xf32, #tpu.memory_space<vmem>>, vector<1x8x16xf32>
    %37 = vector.shape_cast %36 : vector<1x8x16xf32> to vector<8x16xf32>
    %38 = vector.shape_cast %35 : vector<8x16xf32> to vector<1x8x16xf32>
    tpu.vector_store %arg3[%c0_16, %c0_17, %c0_18], %38 {strides = array<i32>} : memref<1x8x16xf32, #tpu.memory_space<vmem>>, vector<1x8x16xf32>,
    return
  }
  func.func @transform_0(%arg0: i32) -> (i32, i32, i32) {
    %c0_i32 = arith.constant 0 : i32
    %c0_i32_0 = arith.constant 0 : i32
    %c0_i32_1 = arith.constant 0 : i32
    return %arg0, %c0_i32, %c0_i32_0 : i32, i32, i32
  }
  func.func @transform_1(%arg0: i32) -> (i32, i32, i32) {
    %c0_i32 = arith.constant 0 : i32
    %c0_i32_0 = arith.constant 0 : i32
    %c0_i32_1 = arith.constant 0 : i32
    %c0_i32_2 = arith.constant 0 : i32
    return %c0_i32, %c0_i32_0, %c0_i32_1 : i32, i32, i32
  }
  func.func @transform_2(%arg0: i32) -> (i32, i32, i32) {
    %c0_i32 = arith.constant 0 : i32
    %c0_i32_0 = arith.constant 0 : i32
    %c0_i32_1 = arith.constant 0 : i32
    return %arg0, %c0_i32, %c0_i32_0 : i32, i32, i32
  }
}

</mosaic_0001>

<bundles_post_ra>
// kernel: tpu_custom_call.1
= control target key start
LH: loop header
LB: loop body
LE: loop exit
PB: predicated region body
PF: predicated region fallthrough
CT: control target
= control target key end

     0   :  { %7 = vsyncpa [#allocation3], 0  ;;  %s1445_s0 = inlined_call_operand.vmem [shape: f32[2,8,32], index: 0, kind: input, shape index: {}]   ;;  %s1446_s1 = inlined_call_operand.vmem [shape: f32[3,32,16], index: 1, kind: input, shape index: {}]   ;;  %s1447_s2 = inlined_call_operand.hbm [shape: f32[2,8,16], index: 2, kind: output, shape index: {}]  }
   0x1   :  { %9 = vsyncpa [#allocation3 + $0x1], 0  ;;  %s1230_s9 = smov 0   ;;  %s1232_s10 = smov 0  }
   0x2   :  { %s1234_s11 = smov 0   ;;  %s1236_s12 = smov 0  }
   0x3 LB: > { %s1251_s13 = sadd.s32 4294967295, %s1206_s12   ;;  %s985_s14 = sadd.s32 4294967294, %s1206_s12   ;;  %s1206_s12 = sphi %s1236_s12, %s1453_s12   ;;  %s1202_s11 = sphi %s1234_s11, %s1452_s11   ;;  %s1198_s10 = sphi %s1232_s10, %s1451_s10   ;;  %s1194_s9 = sphi %s1230_s9, %s1450_s9  }
   0x4   : > { %s1255_s15 = sadd.s32 1, %s1206_s12   ;;  %s69_s16 = sadd.s32 1, %s1202_s11 }
   0x5   : > { %s66_s17 = ssub.s32 %s1206_s12, %s1255_s15  ;;  %p79_p0 = scmp.ne.s32.totalorder %s1202_s11, %s1198_s10 }
   0x6   : > { %p67_p1 = scmp.eq.s32.totalorder %s66_s17, 0  ;;  %p80_p2 = scmp.eq.s32.totalorder %s1251_s13, 1 }
   0x7   : > { %p85_p3 = scmp.ne.s32.totalorder %s1198_s10, %s1194_s9  ;;  %p86_p4 = scmp.eq.s32.totalorder %s985_s14, 1 }
   0x8   : > { %s1266_s18 = scalar_select %p67_p1, %s1202_s11, %s69_s16  }
   0x9   : > { %p1268_p5 = por %p80_p2, %p79_p0  ;;  %p1272_p6 = por %p86_p4, %p85_p3 }
   0xa   : > { %p988_p7 = scmp.ge.s32.totalorder %s1206_s12, 1  ;;  %p114_p8 = scmp.lt.s32.totalorder %s1206_s12, 3 }
   0xc   : > { %p115_p9 = pnand %p988_p7, %p114_p8 }
   0xd   : > { %v140_v0 = vld [vmem:[%s1446_s1] sm:$0xff] (!%p115_p9)  ;;  %v141_v1 = vld [vmem:[%s1446_s1 + $0x8] sm:$0xff] (!%p115_p9)  ;;  %v1208_v3 = vmov (!%p115_p9), 0.0|0.0   ;;  %v142_v6 = vld [vmem:[%s1446_s1 + $0x10] sm:$0xff] (!%p115_p9)  ;;  %p135_p10 = scmp.lt.s32.totalorder (!%p115_p9), %s1251_s13, 1  ;;  %vm1209_vm0 = vmmov (!%p115_p9), 0   ;;  %v373_v23 = vlaneseq (!%p115_p9) }
   0xe   : > { %118 = sbr.rel (%p115_p9) target bundleno = 874 (0x36a), region = 28  ;;  %v991_v2 = vld [vmem:[%s1446_s1 + $0x20] sm:$0xff] (!%p115_p9)  ;;  %1077 = vmatprep.subr.bf16.mxu0 (!%p115_p9), %v1208_v3  ;;  %1083 = vmatprep.subr.bf16.mxu1 (!%p115_p9), %v1208_v3  ;;  %v1078_v4 = vpack.c.bf16 (!%p115_p9), %v141_v1, %v140_v0  ;;  %v992_v5 = vld [vmem:[%s1446_s1 + $0x28] sm:$0xff] (!%p115_p9)  ;;  %v143_v7 = vld [vmem:[%s1446_s1 + $0x18] sm:$0xff] (!%p115_p9)  ;;  %v1210_v11 = vmov (!%p115_p9), 0.0   ;;  %vm154_vm1 = vcmask (!%p115_p9), 261120  }
   0xf   : > { %v1084_v8 = vpack.c.bf16 (!%p115_p9), %v992_v5, %v991_v2  ;;  %v993_v9 = vld [vmem:[%s1446_s1 + $0x30] sm:$0xff] (!%p115_p9)  ;;  %v994_v10 = vld [vmem:[%s1446_s1 + $0x38] sm:$0xff] (!%p115_p9)  ;;  %1042 = vmatprep.mubr.msk.f32.mxu0 (!%p115_p9), %vm1209_vm0, %v1210_v11  ;;  %1053 = vmatprep.mubr.msk.f32.mxu1 (!%p115_p9), %vm1209_vm0, %v1210_v11  ;;  %v1081_v12 = vpack.c.bf16 (!%p115_p9), %v143_v7, %v142_v6  ;;  %v995_v15 = vld [vmem:[%s1446_s1 + $0x40] sm:$0xff] (!%p115_p9)  ;;  %v1211_v21 = vmov (!%p115_p9), 1966171168   ;;  %v1331_v25 = vshrl.u32 (!%p115_p9), %v373_v23, 7 }
  0x10   : > { %1079 = vmatpush3.bf16.msra.mxu0 (!%p115_p9), %v1078_v4  ;;  %v1087_v13 = vpack.c.bf16 (!%p115_p9), %v994_v10, %v993_v9  ;;  %v996_v16 = vld [vmem:[%s1446_s1 + $0x48] sm:$0xff] (!%p115_p9)  ;;  %v997_v17 = vld [vmem:[%s1446_s1 + $0x50] sm:$0xff] (!%p115_p9)  ;;  %v998_v19 = vld [vmem:[%s1446_s1 + $0x58] sm:$0xff] (!%p115_p9)  ;;  %v371_v22 = vunpack.c.l.s4 (!%p115_p9), %v1211_v21  ;;  %vm616_vm2 = vcmask (!%p115_p9), 130048   ;;  %vm697_vm4 = vcmask (!%p115_p9), 64512   ;;  %s132_s3 = sand.u32 (!%p115_p9), 1, %s1198_s10  }
  0x11   : > { %1085 = vmatpush3.bf16.msra.mxu1 (!%p115_p9), %v1084_v8  ;;  %1080 = vmatprep.subr.bf16.mxu0 (!%p115_p9), %v1208_v3  ;;  %v1090_v18 = vpack.c.bf16 (!%p115_p9), %v996_v16, %v995_v15  ;;  %v1093_v20 = vpack.c.bf16 (!%p115_p9), %v998_v19, %v997_v17  ;;  %s1390_s4 = sshll.u32 (!%p115_p9), %s132_s3, 3  ;;  %vm890_vm5 = vcmask (!%p115_p9), 1041409   ;;  %vm893_vm6 = vcmask (!%p115_p9), 1042434   ;;  %s1012_s5 = sshll.u32 (!%p115_p9), %s1251_s13, 7 }
  0x12   : > { %1086 = vmatprep.subr.bf16.mxu1 (!%p115_p9), %v1208_v3  ;;  %v372_v24 = vunpack.c.0.s8 (!%p115_p9), %v371_v22  ;;  %vm896_vm7 = vcmask (!%p115_p9), 1043459   ;;  %vm899_vm8 = vcmask (!%p115_p9), 1044484   ;;  %vm902_vm9 = vcmask (!%p115_p9), 1045509   ;;  %s134_s6 = scalar_lea.vmem (!%p115_p9), [#allocation2], %s1390_s4  ;;  %s1214_s21 = smov (!%p115_p9), [#allocation2]  }
  0x13   : > { %vm905_vm10 = vcmask (!%p115_p9), 1046534   ;;  %s926_s7 = sshll.u32 (!%p115_p9), %s134_s6, 4  ;;  %vm908_vm11 = vcmask (!%p115_p9), 1047559   ;;  %s1402_s7 = int_to_ptr.vmem [resolvable:$true] %s926_s7 }
  0x14   : > { %1082 = vmatpush3.bf16.msra.mxu0 (!%p115_p9), %v1081_v12  ;;  %v1334_v26 = vsub.s32 (!%p115_p9), %v372_v24, %v1331_v25  ;;  %s1144_s17 = scalar_lea.vmem (!%p115_p9), %s1402_s7, 128 }
  0x15   : > { %s136_s14 = scalar_select %p135_p10, %s1251_s13, 1  ;;  %1088 = vmatpush3.bf16.msra.mxu1 %v1087_v13  ;;  %1089 = vmatprep.subr.bf16.mxu0 %v1208_v3 }
  0x16   : > { %1067 = vmatprep.subr.mxu1 %v1210_v11  ;;  %s913_s13 = scalar_lea.sflag [#allocation3], %s132_s3  ;;  %p1145_p11 = scmp.ne.s32.totalorder %s1402_s7, %s1144_s17 }
  0x17   : > { %s990_s16 = sshll.u32 %s136_s14, 3 }
  0x18   : > { %s138_s22 = scalar_lea.vmem %s1445_s0, %s990_s16  ;;  %s1400_s16 = scalar_lea.hbm %s1447_s2, %s1012_s5 }
  0x19   : > { %v139_v14 = vld [vmem:[%s138_s22] sm:$0xff]  ;;  %p1146_p12 = pnand %p1145_p11, %p1268_p5  ;;  %s1148_s22 = sshll.u32 %s1214_s21, 4  ;;  %s1149_s22 = int_to_ptr.vmem [resolvable:$false] %s1148_s22 }
  0x1a   : > { %1043 = vmatmul.mubr.msk.f32.vlgmr.msra.gmra.mrb[0].mxu0 %vm154_vm1, %v139_v14  ;;  %1054 = vmatmul.mubr.msk.f32.vlgmr.msra.gmra.mrb[0].mxu1 %vm154_vm1, %v139_v14  ;;  %s1150_s23 = scalar_lea.vmem %s1149_s22, 256  ;;  %p1151_p0 = scmp.lt.s32.totalorder %s1402_s7, %s1149_s22 }
  0x1b   : > { %1064 = vmatprep.mubr.msk.f32.mxu0 %vm1209_vm0, %v1210_v11  ;;  %1069 = vmatprep.mubr.msk.f32.mxu1 %vm1209_vm0, %v1210_v11  ;;  %p1147_p13 = pneg %p1146_p12  ;;  %p1152_p1 = scmp.lt.s32.totalorder %s1150_s23, %s1144_s17 }
  0x1c   : > { %1091 = vmatpush3.bf16.msra.mxu0 %v1090_v18 }
  0x1d   : > { %1092 = vmatprep.subr.bf16.mxu0 %v1208_v3  ;;  %p1153_p2 = por %p1152_p1, %p1151_p0 }
  0x1f   : > { %p1154_p3 = pnand %p1153_p2, %p1147_p13 }
  0x20   : > { %1094 = vmatpush3.bf16.msra.mxu0 %v1093_v20 }
  0x23   : > { %1065 = vmatmul.mubr.msk.f32.vlgmr.msra.gmra.mrb[2].mxu0 %vm154_vm1, %v139_v14  ;;  %v694_v14 = vand.u32 127, %v373_v23 }
  0x25   : > { %vm695_vm3 = vcmp.le.s32.totalorder %v694_v14, %v1331_v25 }
  0xed   : > { %v224_v27 = vpop.f32.mrb[0].mxu0  ;;  %v294_v30 = vpop.f32.mrb[0].mxu1 }
  0xee   : > { %v369_v28 = vcombine.high %v224_v27, %v224_v27  ;;  %v376_v29 = vrot.slane %v224_v27, %v1334_v26  ;;  %v1044_v31 = vpop.f32.mrb[1].mxu0  ;;  %v419_v32 = vcombine.high %v294_v30, %v294_v30  ;;  %v426_v33 = vrot.slane %v294_v30, %v1334_v26  ;;  %v1055_v34 = vpop.f32.mrb[1].mxu1 }
  0xf0   : > { %v383_v35 = vrot.slane %v369_v28, %v1334_v26  ;;  %v384_v36 = vcombine.high %v376_v29, %v376_v29  ;;  %v392_v37 = vrot.slane %v376_v29, %v1334_v26  ;;  %v433_v38 = vrot.slane %v419_v32, %v1334_v26 }
  0xf1   : > { %v434_v39 = vcombine.high %v426_v33, %v426_v33  ;;  %v442_v44 = vrot.slane %v426_v33, %v1334_v26 }
  0xf2   : > { %v385_v40 = vcombine.high %v383_v35, %v383_v35  ;;  %v399_v41 = vrot.slane %v383_v35, %v1334_v26  ;;  %v406_v42 = vrot.slane %v384_v36, %v1334_v26  ;;  %v435_v43 = vcombine.high %v433_v38, %v433_v38 }
  0xf3   : > { %v456_v45 = vrot.slane %v434_v39, %v1334_v26  ;;  %v449_v49 = vrot.slane %v433_v38, %v1334_v26 }
  0xf4   : > { %v413_v46 = vrot.slane %v385_v40, %v1334_v26  ;;  %v518_v47 = vcombine.low %v392_v37, %v406_v42  ;;  %v1002_v48 = vcombine.high %v392_v37, %v406_v42  ;;  %v463_v50 = vrot.slane %v435_v43, %v1334_v26 }
  0xf5   : > { %v567_v51 = vcombine.low %v442_v44, %v456_v45  ;;  %v1004_v52 = vcombine.high %v442_v44, %v456_v45 }
  0xf6   : > { %v520_v53 = vcombine.low %v399_v41, %v413_v46  ;;  %v1003_v54 = vcombine.high %v399_v41, %v413_v46  ;;  %v528_v55 = vrot.slane %v518_v47, %v1334_v26  ;;  %v535_v56 = vrot.slane %v1002_v48, %v1334_v26  ;;  %v364_v12 = vpop.f32.mrb[2].mxu0 }
  0xf7   : > { %v569_v57 = vcombine.low %v449_v49, %v463_v50  ;;  %v1005_v58 = vcombine.high %v449_v49, %v463_v50  ;;  %v577_v59 = vrot.slane %v567_v51, %v1334_v26  ;;  %v584_v60 = vrot.slane %v1004_v52, %v1334_v26  ;;  %v1066_v13 = vpop.f32.mrb[3].mxu0 }
  0xf8   : > { %v542_v61 = vrot.slane %v520_v53, %v1334_v26  ;;  %v549_v62 = vrot.slane %v1003_v54, %v1334_v26  ;;  %v550_v2 = vcombine.low %v528_v55, %v535_v56  ;;  %v469_v15 = vcombine.high %v364_v12, %v364_v12 }
  0xf9   : > { %v591_v63 = vrot.slane %v569_v57, %v1334_v26  ;;  %v598_v0 = vrot.slane %v1005_v58, %v1334_v26  ;;  %v599_v1 = vcombine.low %v577_v59, %v584_v60  ;;  %v476_v16 = vrot.slane %v364_v12, %v1334_v26 }
  0xfa   : > { %v551_v3 = vcombine.low %v542_v61, %v549_v62  ;;  %v558_v7 = vrot.slane %v550_v2, %v1334_v26  ;;  %v483_v20 = vrot.slane %v469_v15, %v1334_v26  ;;  %v1212_v49 = vmov 1983009808  }
  0xfb   : > { %v600_v4 = vcombine.low %v591_v63, %v598_v0  ;;  %v607_v5 = vrot.slane %v599_v1, %v1334_v26  ;;  %v484_v21 = vcombine.high %v476_v16, %v476_v16  ;;  %v492_v27 = vrot.slane %v476_v16, %v1334_v26 }
  0xfc   : > { %v565_v8 = vrot.slane %v551_v3, %v1334_v26  ;;  %v485_v24 = vcombine.high %v483_v20, %v483_v20  ;;  %v499_v28 = vrot.slane %v483_v20, %v1334_v26  ;;  %v834_v50 = vunpack.c.l.s4 %v1212_v49 }
  0xfd   : > { %v614_v6 = vrot.slane %v600_v4, %v1334_v26  ;;  %v506_v23 = vrot.slane %v484_v21, %v1334_v26  ;;  %v1213_v51 = vmov 1934713408  }
  0xfe   : > { %v566_v10 = vcombine.low %v558_v7, %v565_v8  ;;  %v513_v29 = vrot.slane %v485_v24, %v1334_v26  ;;  %v849_v52 = vunpack.c.l.s4 %v1213_v51 }
  0xff   : > { %v615_v9 = vcombine.low %v607_v5, %v614_v6  ;;  %v707_v30 = vcombine.low %v492_v27, %v506_v23  ;;  %v1008_v31 = vcombine.high %v492_v27, %v506_v23 }
 0x100   : > { %v709_v32 = vcombine.low %v499_v28, %v513_v29  ;;  %v1009_v33 = vcombine.high %v499_v28, %v513_v29  ;;  %v850_v53 = vunpack.c.0.s8 %v849_v52 }
 0x101   : > { %1068 = vmatpush3.xpose.msk.msra.mxu1 %vm616_vm2, %v615_v9  ;;  %v717_v34 = vrot.slane %v707_v30, %v1334_v26  ;;  %v724_v35 = vrot.slane %v1008_v31, %v1334_v26 }
 0x102   : > { %1072 = vmatprep.subr.mxu1 %v1210_v11  ;;  %v731_v36 = vrot.slane %v709_v32, %v1334_v26  ;;  %v738_v37 = vrot.slane %v1009_v33, %v1334_v26  ;;  %v853_v58 = vsub.s32 %v850_v53, %v1331_v25 }
 0x103   : > { %v739_v38 = vcombine.low %v717_v34, %v724_v35 }
 0x104   : > { %1070 = vmatmul.mubr.msk.f32.vlgmr.msra.gmra.mrb[2].mxu1 %vm616_vm2, %v566_v10  ;;  %v740_v39 = vcombine.low %v731_v36, %v738_v37 }
 0x105   : > { %1074 = vmatprep.mubr.msk.f32.mxu1 %vm1209_vm0, %v1210_v11  ;;  %v747_v40 = vrot.slane %v739_v38, %v1334_v26 }
 0x106   : > { %v754_v41 = vrot.slane %v740_v39, %v1334_v26  ;;  %v835_v26 = vunpack.c.0.s8 %v834_v50 }
 0x108   : > { %v755_v42 = vcombine.low %v747_v40, %v754_v41  ;;  %v838_v54 = vsub.s32 %v835_v26, %v1331_v25 }
 0x10a   : > { %1073 = vmatpush3.msra.mxu1 %v755_v42 }
 0x1d7   : > { %v687_v17 = vpop.f32.mrb[2].mxu1 }
 0x1d8   : > { %v696_v18 = vsel %vm695_vm3, %v687_v17, -2.3819763e+38  ;;  %v1071_v19 = vpop.f32.mrb[3].mxu1 }
 0x1d9   : > { %v698_v22 = vsel %vm697_vm4, %v696_v18, -inf }
 0x1da   : > { %699 = vmax.xlane.f32.xlu0 %v698_v22 }
 0x267   : > { %v700_v43 = vpop.xlane.xlu0 %699 }
 0x268   : > { %v701_v44 = vsub.f32 %v696_v18, %v700_v43 }
 0x26a   : > { %v702_v45 = vmul.f32 1.442695, %v701_v44 }
 0x26c   : > { %1140 = vpow2.f32 %v702_v45 }
 0x276   : > { %v1141_v46 = vpop.eup %1140 }
 0x277   : > { %1075 = vmatmul.mubr.msk.f32.vlgmr.msra.gmra.mrb[4].mxu1 %vm697_vm4, %v1141_v46  ;;  %v704_v47 = vsel %vm697_vm4, %v1141_v46, 0.0 }
 0x278   : > { %705 = vadd.xlane.f32.xlu0 %v704_v47 }
 0x305   : > { %v706_v48 = vpop.xlane.xlu0 %705 }
 0x306   : > { %1142 = vrcp.f32 %v706_v48 }
 0x310   : > { %v1143_v55 = vpop.eup %1142 }
 0x34a   : > { %v826_v56 = vpop.f32.mrb[4].mxu1 }
 0x34b   : > { %v831_v57 = vmul.f32 %v1143_v55, %v826_v56  ;;  %v1076_v59 = vpop.f32.mrb[5].mxu1 }
 0x34d   : > { %v832_v60 = vcombine.high %v831_v57, %v1210_v11  ;;  %v839_v61 = vrot.slane %v831_v57, %v838_v54 }
 0x34f   : > { %v846_v62 = vrot.slane %v832_v60, %v838_v54  ;;  %v847_v63 = vcombine.high %v839_v61, %v1210_v11  ;;  %v854_v0 = vrot.slane %v839_v61, %v853_v58 }
 0x351   : > { %v861_v1 = vrot.slane %v847_v63, %v853_v58  ;;  %v862_v2 = vcombine.high %v846_v62, %v1210_v11  ;;  %v869_v3 = vrot.slane %v846_v62, %v853_v58  ;;  %v877_v4 = vcombine.high %v854_v0, %v1210_v11 }
 0x353   : > { %v876_v25 = vrot.slane %v862_v2, %v853_v58  ;;  %v878_v5 = vcombine.high %v861_v1, %v1210_v11  ;;  %v879_v6 = vcombine.high %v869_v3, %v1210_v11  ;;  %v889_v7 = vrot.slane %v877_v4, 7 }
 0x354   : > { %v892_v8 = vrot.slane %v861_v1, 6  ;;  %v898_v14 = vrot.slane %v869_v3, 4 }
 0x355   : > { %v880_v9 = vcombine.high %v876_v25, %v1210_v11  ;;  %v891_v10 = vsel %vm890_vm5, %v889_v7, %v854_v0  ;;  %v895_v12 = vrot.slane %v878_v5, 5  ;;  %v901_v16 = vrot.slane %v879_v6, 3 }
 0x356   : > { %v894_v13 = vsel %vm893_vm6, %v892_v8, %v891_v10  ;;  %v904_v17 = vrot.slane %v876_v25, 2 }
 0x357   : > { %v897_v15 = vsel %vm896_vm7, %v895_v12, %v894_v13  ;;  %v907_v20 = vrot.slane %v880_v9, 1 }
 0x358   : > { %v900_v18 = vsel %vm899_vm8, %v898_v14, %v897_v15 }
 0x359   : > { %v903_v19 = vsel %vm902_vm9, %v901_v16, %v900_v18 }
 0x35a   : > { %v906_v11 = vsel %vm905_vm10, %v904_v17, %v903_v19 }
 0x35b   : > { %v909_v21 = vsel %vm908_vm11, %v907_v20, %v906_v11 }
 0x35c   : > { %911 = vst.msk [vmem:[%s134_s6] sm:$0xff] %vm616_vm2, %v909_v21 }
 0x35d   : > { %1157 = shalt.err (!%p1154_p3)
}
 0x35e   : > { %s1158_s24 = scalar_lea.hbm %s1400_s16, 128  ;;  %s1162_s27 = scalar_lea.hbm %s1447_s2, 256 }
 0x35f   : > { %p1159_p4 = scmp.ne.s32.totalorder %s1400_s16, %s1158_s24  ;;  %p1163_p9 = scmp.lt.u32.totalorder %s1400_s16, %s1447_s2 }
 0x360   : > { %p1164_p10 = scmp.lt.u32.totalorder %s1162_s27, %s1158_s24  ;;  %p1166_p12 = scmp.lt.u32.totalorder %s1158_s24, %s1400_s16 }
 0x361   : > { %p1160_p7 = pnand %p1159_p4, %p1268_p5 }
 0x362   : > { %p1165_p11 = por %p1164_p10, %p1163_p9 }
 0x363   : > { %p1161_p8 = pneg %p1160_p7 }
 0x364   : > { %p1167_p13 = por %p1166_p12, %p1165_p11 }
 0x366   : > { %p1168_p0 = pnand %p1167_p13, %p1161_p8 }
 0x368   : > { %1171 = shalt.err (!%p1168_p0)
}
 0x369   : > { %1095 = dma.vmem_to_hbm [thread:$0]  (%p1268_p5), %s1402_s7, 128, %s1400_s16, %s913_s13  }
 0x36a PF: > { %p1101_p1 = scmp.ge.s32.totalorder %s1206_s12, 2  ;;  %s938_s30 = sand.u32 1, %s1194_s9  }
 0x36b   : > { %s939_s3 = scalar_lea.sflag [#allocation3], %s938_s30 }
 0x36c   : > { %p1098_p2 = pnand %p1101_p1, %p1272_p6 }
 0x36e   : > { %1189 = dma.done.wait (!%p1098_p2), %s939_s3, 128  }
 0x36f   : > { %1191 = vsyncadd (!%p1098_p2), %s939_s3, 4294967168  ;;  %p12_p3 = scmp.ge.s32.totalorder %s1255_s15, 4   ;;  %s1450_s9 = smov %s1198_s10 }
 0x370   : > { %s1451_s10 = smov %s1202_s11  ;;  %s1452_s11 = smov %s1266_s18 }
 0x371   : > { %s1453_s12 = smov %s1255_s15  ;;  %14 = sbr.rel (!%p12_p3) target bundleno = 3 (0x3), region = 65 }
 0x378   :  { %944 = vsyncpa [#allocation3], 1 }
 0x379   :  { %946 = vsyncpa [#allocation3 + $0x1], 1 }

</bundles_post_ra>
